<compile_context>
chip_gen: v5e
topology: v5e:2x2
jax: 0.10.0
libtpu: 0.0.40
codegen_flags: <defaults>
</compile_context>

<pallas_src>
import functools

import numpy as np
import jax
import jax.numpy as jnp
from jax import lax
from jax.experimental import pallas as pl
from jax.experimental.pallas import tpu as pltpu


_VMEM_LIMIT_BYTES = 48 * 1024 * 1024    # > scoped defaults (16/32 MiB), < v7x 64 MiB physical
_VMEM_BUDGET_BYTES = 44 * 1024 * 1024   # planning budget (headroom under the limit)


def _round_up(a, b):
    return (a + b - 1) // b * b


def _pick_tile(total, want, unit=128):
    """Largest multiple of `unit` <= min(want, total) that divides `total`.
    `total` must be a multiple of `unit`."""
    t = max(unit, (min(want, total) // unit) * unit)
    while total % t:
        t -= unit
    return t


def precompute_expk(n, dtype=jnp.float32):
    """Mirror of DREAMPlace precompute_expk: expk[k] = (2cos(pi k/(2n)), 2sin(pi k/(2n)))."""
    k = jnp.arange(n, dtype=jnp.float32) * (jnp.pi / (2.0 * n))
    return jnp.stack([2.0 * jnp.cos(k), 2.0 * jnp.sin(k)], axis=-1).astype(dtype)


@functools.lru_cache(maxsize=16)
def _cached_bases(m, n, mp, np_pad, dtype):
    """Zero-padded dense bases, built once per (M, N, padded layout, dtype).

    S[u, p]  = sin(pi * p * (2u + 1) / (2M))   (IDXST basis, p=0 column is zero)
    CT[q, v] = cos(pi * q * (2v + 1) / (2N))   (transposed IDCT basis)
    Padding with zeros is exact: padded rows/cols contribute nothing.
    """
    u = jnp.arange(m, dtype=jnp.float32)[:, None]
    p = jnp.arange(m, dtype=jnp.float32)[None, :]
    s = jnp.sin(jnp.pi * p * (2.0 * u + 1.0) / (2.0 * m))
    q = jnp.arange(n, dtype=jnp.float32)[:, None]
    v = jnp.arange(n, dtype=jnp.float32)[None, :]
    ct = jnp.cos(jnp.pi * q * (2.0 * v + 1.0) / (2.0 * n))
    s_p = jnp.pad(s, ((0, mp - m), (0, mp - m))).astype(dtype)
    ct_p = jnp.pad(ct, ((0, np_pad - n), (0, np_pad - n))).astype(dtype)
    return jax.device_put(s_p), jax.device_put(ct_p)


# ---------------------------------------------------------------------------
# Fused path: out = S @ (x @ CT), intermediate y never touches HBM.
# ---------------------------------------------------------------------------
def _fused_kernel(x_ref, ct_ref, s_ref, o_ref, y_ref):
    # grid = (J, I): j (outer) = output column panels, i (inner) = row tiles.
    @pl.when(pl.program_id(1) == 0)
    def _():
        # IDCT along the last dim for this column panel: y = x @ CT[:, panel j]
        y_ref[...] = jnp.dot(x_ref[...], ct_ref[...],
                             preferred_element_type=jnp.float32).astype(y_ref.dtype)

    # IDXST along the first dim: out tile = S[rows i, :] @ y
    o_ref[...] = jnp.dot(s_ref[...], y_ref[...],
                         preferred_element_type=jnp.float32).astype(o_ref.dtype)


def _fused_vmem_bytes(mp, np_pad, bm, bn, e_cd, e_out):
    # Conservative: assume every streamed operand (even constant-index x) is
    # double-buffered by the BlockSpec pipeline.
    return (2 * mp * np_pad * e_cd      # x (resident)
            + 2 * np_pad * bn * e_cd    # CT column panel
            + 2 * bm * mp * e_cd        # S row panel
            + 2 * bm * bn * e_out       # out tile
            + mp * bn * e_cd)           # y scratch


def _fused_call(x_p, s_p, ct_p, out_dtype, bm, bn):
    mp, np_pad = x_p.shape
    e_cd = x_p.dtype.itemsize
    e_out = np.dtype(out_dtype).itemsize
    flops = 2 * mp * np_pad * np_pad + 2 * mp * mp * np_pad
    bytes_accessed = (mp * np_pad + np_pad * np_pad + mp * mp) * e_cd + mp * np_pad * e_out
    return pl.pallas_call(
        _fused_kernel,
        out_shape=jax.ShapeDtypeStruct((mp, np_pad), out_dtype),
        grid_spec=pltpu.PrefetchScalarGridSpec(
            num_scalar_prefetch=0,
            grid=(np_pad // bn, mp // bm),                      # (J, I)
            in_specs=[
                pl.BlockSpec((mp, np_pad), lambda j, i: (0, 0)),  # x: resident
                pl.BlockSpec((np_pad, bn), lambda j, i: (0, j)),  # CT column panel
                pl.BlockSpec((bm, mp), lambda j, i: (i, 0)),      # S row panel
            ],
            out_specs=pl.BlockSpec((bm, bn), lambda j, i: (i, j)),
            scratch_shapes=[pltpu.VMEM((mp, bn), x_p.dtype)],
        ),
        compiler_params=pltpu.CompilerParams(
            dimension_semantics=("parallel", "arbitrary"),
            vmem_limit_bytes=_VMEM_LIMIT_BYTES,
        ),
        cost_estimate=pl.CostEstimate(flops=int(flops), transcendentals=0,
                                      bytes_accessed=int(bytes_accessed)),
    )(x_p, ct_p, s_p)


# ---------------------------------------------------------------------------
# Large-map fallback: two tiled matmuls on padded operands.
# ---------------------------------------------------------------------------
def _mm_kernel(a_ref, b_ref, o_ref):
    # Full-K reduction: no accumulator scratch, no init/store epilogue.
    o_ref[...] = jnp.dot(a_ref[...], b_ref[...],
                         preferred_element_type=jnp.float32).astype(o_ref.dtype)


def _mm_acc_kernel(a_ref, b_ref, o_ref, acc_ref):
    @pl.when(pl.program_id(2) == 0)
    def _():
        acc_ref[...] = jnp.zeros_like(acc_ref)

    acc_ref[...] += jnp.dot(a_ref[...], b_ref[...], preferred_element_type=jnp.float32)

    @pl.when(pl.program_id(2) == pl.num_programs(2) - 1)
    def _():
        o_ref[...] = acc_ref[...].astype(o_ref.dtype)


def _tiled_matmul(a, b, out_dtype, *, bm_req=512, bn_req=512, bk_req=4096):
    """A @ B on already-padded operands (all dims multiples of 128); padded output."""
    m, k = a.shape
    k2, n = b.shape
    assert k == k2 and m % 128 == 0 and n % 128 == 0 and k % 128 == 0
    e = a.dtype.itemsize
    e_out = np.dtype(out_dtype).itemsize

    bm = _pick_tile(m, bm_req)
    bn = _pick_tile(n, bn_req)
    bk = _pick_tile(k, bk_req)

    def fits(bm_, bn_, bk_):
        return (2 * (bm_ * bk_ + bk_ * bn_) * e + 2 * bm_ * bn_ * e_out
                + bm_ * bn_ * 4) <= _VMEM_BUDGET_BYTES

    while not fits(bm, bn, bk) and bk > 128:
        bk = _pick_tile(k, bk // 2)
    while not fits(bm, bn, bk) and max(bm, bn) > 128:
        if bm >= bn:
            bm = _pick_tile(m, bm // 2)
        else:
            bn = _pick_tile(n, bn // 2)

    ksteps = k // bk
    flops = 2 * m * n * k
    bytes_accessed = (m * k + k * n) * e + m * n * e_out
    ce = pl.CostEstimate(flops=int(flops), transcendentals=0,
                         bytes_accessed=int(bytes_accessed))

    if ksteps == 1:
        call = pl.pallas_call(
            _mm_kernel,
            out_shape=jax.ShapeDtypeStruct((m, n), out_dtype),
            grid_spec=pltpu.PrefetchScalarGridSpec(
                num_scalar_prefetch=0,
                grid=(m // bm, n // bn),
                in_specs=[pl.BlockSpec((bm, k), lambda i, j: (i, 0)),
                          pl.BlockSpec((k, bn), lambda i, j: (0, j))],
                out_specs=pl.BlockSpec((bm, bn), lambda i, j: (i, j)),
            ),
            compiler_params=pltpu.CompilerParams(
                dimension_semantics=("parallel", "parallel"),
                vmem_limit_bytes=_VMEM_LIMIT_BYTES),
            cost_estimate=ce,
        )
    else:
        call = pl.pallas_call(
            _mm_acc_kernel,
            out_shape=jax.ShapeDtypeStruct((m, n), out_dtype),
            grid_spec=pltpu.PrefetchScalarGridSpec(
                num_scalar_prefetch=0,
                grid=(m // bm, n // bn, ksteps),
                in_specs=[pl.BlockSpec((bm, bk), lambda i, j, kk: (i, kk)),
                          pl.BlockSpec((bk, bn), lambda i, j, kk: (kk, j))],
                out_specs=pl.BlockSpec((bm, bn), lambda i, j, kk: (i, j)),
                scratch_shapes=[pltpu.VMEM((bm, bn), jnp.float32)],
            ),
            compiler_params=pltpu.CompilerParams(
                dimension_semantics=("parallel", "parallel", "arbitrary"),
                vmem_limit_bytes=_VMEM_LIMIT_BYTES),
            cost_estimate=ce,
        )
    return call(a, b)


# ---------------------------------------------------------------------------
# Public entry point (mirrors IDXST_IDCT.forward).
# ---------------------------------------------------------------------------
def idxst_idct(x, expkM=None, expkN=None, *, compute_dtype=None,
               bm=512, bn=512, bk=4096,
               max_fused_vmem_bytes=_VMEM_BUDGET_BYTES):
    """IDXST along dim -2 and IDCT along dim -1 of a 2-D map x of shape (M, N).

    expkM / expkN are accepted for interface parity with the PyTorch module and
    regenerated on shape/dtype mismatch just like IDXST_IDCT.forward, but their
    twiddle content is folded analytically into the cached dense bases, so
    custom pre-scaled expk tables are not honoured.
    compute_dtype=jnp.bfloat16 selects the bf16-MXU path (f32 accumulation),
    the fast path on v5e/v6e/v7x; the default keeps f32 operands for numerics.
    """
    assert x.ndim == 2
    M, N = x.shape
    dtype = x.dtype
    if expkM is None or expkM.shape[-2] != M or expkM.dtype != dtype:
        expkM = precompute_expk(M, dtype)
    if expkN is None or expkN.shape[-2] != N or expkN.dtype != dtype:
        expkN = precompute_expk(N, dtype)
    del expkM, expkN  # folded into the dense bases

    cd = np.dtype(dtype if compute_dtype is None else compute_dtype)
    e_cd = cd.itemsize
    e_out = np.dtype(dtype).itemsize

    Mp = _round_up(M, 128)
    Np = _round_up(N, 128)
    s_p, ct_p = _cached_bases(M, N, Mp, Np, cd)

    x_p = x.astype(cd)
    if (Mp, Np) != (M, N):
        x_p = jnp.pad(x_p, ((0, Mp - M), (0, Np - N)))

    bm_t = _pick_tile(Mp, bm)
    bn_t = _pick_tile(Np, bn)

    def fused_fits(bm_, bn_):
        return _fused_vmem_bytes(Mp, Np, bm_, bn_, e_cd, e_out) <= max_fused_vmem_bytes

    while not fused_fits(bm_t, bn_t) and max(bm_t, bn_t) > 128:
        if bm_t >= bn_t:
            bm_t = _pick_tile(Mp, bm_t // 2)
        else:
            bn_t = _pick_tile(Np, bn_t // 2)

    if fused_fits(bm_t, bn_t):
        # v7x has two TensorCores: make sure the parallel axis has >= 2 panels.
        if (Np // bn_t) * (Mp // bm_t) < 2 and Np >= 256:
            bn_t = _pick_tile(Np, max(bn_t // 2, 128))
        out_p = _fused_call(x_p, s_p, ct_p, dtype, bm_t, bn_t)
    else:
        # Fallback: two tiled matmuls; intermediate y stays in the padded
        # (Mp, Np) layout between the calls (no slice + re-pad round trip).
        y_p = _tiled_matmul(x_p, ct_p, cd, bm_req=bm, bn_req=bn, bk_req=bk)
        out_p = _tiled_matmul(s_p, y_p, dtype, bm_req=bm, bn_req=bn, bk_req=bk)

    if (Mp, Np) != (M, N):
        out_p = out_p[:M, :N]
    return out_p


# ---------------------------------------------------------------------------
# Self-test
# ---------------------------------------------------------------------------
def _ref_idxst_idct(x):
    # TODO(synk): numerics follow DREAMPlace's documented idsct2 golden formula;
    # a bit-exact check against the compiled dct2_fft2 CUDA/C++ extension output
    # is not possible in this sandbox, so this reference shares the basis formula.
    M, N = x.shape
    u = jnp.arange(M, dtype=jnp.float32)[:, None]
    p = jnp.arange(M, dtype=jnp.float32)[None, :]
    S = jnp.sin(jnp.pi * p * (2.0 * u + 1.0) / (2.0 * M))
    q = jnp.arange(N, dtype=jnp.float32)[:, None]
    v = jnp.arange(N, dtype=jnp.float32)[None, :]
    CT = jnp.cos(jnp.pi * q * (2.0 * v + 1.0) / (2.0 * N))
    y = jnp.dot(S, x.astype(jnp.float32), precision=lax.Precision.HIGHEST)
    return jnp.dot(y, CT, precision=lax.Precision.HIGHEST)


def _max_rel_err(a, b):
    return float(jnp.max(jnp.abs(a.astype(jnp.float32) - b)) / jnp.max(jnp.abs(b)))


if __name__ == "__main__":
    key = jax.random.PRNGKey(0)

    # 1) Fused path, aligned shapes.
    M, N = 128, 256
    x = jax.random.normal(key, (M, N), dtype=jnp.float32)
    ref = _ref_idxst_idct(x)
    out = jax.block_until_ready(idxst_idct(x))
    assert out.shape == (M, N) and out.dtype == x.dtype
    assert _max_rel_err(out, ref) < 1e-2

    # 2) Fused path with padding (non-multiple-of-128 shapes) + cached bases reuse.
    M2, N2 = 96, 200
    x2 = jax.random.normal(jax.random.PRNGKey(1), (M2, N2), dtype=jnp.float32)
    ref2 = _ref_idxst_idct(x2)
    out2 = jax.block_until_ready(idxst_idct(x2))
    out2b = jax.block_until_ready(idxst_idct(x2))   # second call hits the basis cache
    assert out2.shape == (M2, N2)
    assert _max_rel_err(out2, ref2) < 1e-2
    assert _max_rel_err(out2b, ref2) < 1e-2

    # 3) Two-call tiled fallback (forced), exercising the k-accumulator kernel.
    M3, N3 = 256, 384
    x3 = jax.random.normal(jax.random.PRNGKey(2), (M3, N3), dtype=jnp.float32)
    ref3 = _ref_idxst_idct(x3)
    out3 = jax.block_until_ready(
        idxst_idct(x3, bm=128, bn=128, bk=128, max_fused_vmem_bytes=0))
    assert _max_rel_err(out3, ref3) < 1e-2

    # 4) bf16-MXU path (f32 accumulation), looser tolerance.
    out_bf16 = jax.block_until_ready(idxst_idct(x, compute_dtype=jnp.bfloat16))
    assert out_bf16.dtype == x.dtype
    assert _max_rel_err(out_bf16, ref) < 5e-2

    print("KERNEL_OK")
</pallas_src>

<mosaic_0001>
module attributes {stable_mosaic.version = 11 : i64} {
  func.func @_fused_kernel(%arg0: i32, %arg1: i32, %arg2: memref<128x256xf32, #tpu.memory_space<vmem>>, %arg3: memref<256x128xf32, #tpu.memory_space<vmem>>, %arg4: memref<128x128xf32, #tpu.memory_space<vmem>>, %arg5: memref<128x128xf32, #tpu.memory_space<vmem>>, %arg6: memref<128x128xf32, #tpu.memory_space<vmem>>) attributes {dimension_semantics = [#tpu.dimension_semantics<parallel>, #tpu.dimension_semantics<arbitrary>], iteration_bounds = array<i64: 2, 1>, scalar_prefetch = 0 : i64, scratch_operands = 1 : i64, tpu.core_type = #tpu.core_type<tc>, window_params = [{pipeline_mode = #tpu.pipeline_mode<synchronous>, transform_indices = @transform_0, window_bounds = array<i64: 128, 256>}, {transform_indices = @transform_1, window_bounds = array<i64: 256, 128>}, {transform_indices = @transform_2, window_bounds = array<i64: 128, 128>}, {transform_indices = @transform_3, window_bounds = array<i64: 128, 128>}]} {
    %c0_i32 = arith.constant 0 : i32
    %0 = arith.cmpi eq, %arg1, %c0_i32 : i32
    %1 = arith.extui %0 : i1 to i32
    %c0_i32_0 = arith.constant 0 : i32
    %2 = arith.cmpi ne, %1, %c0_i32_0 : i32
    scf.if %2 {
      %c0_6 = arith.constant 0 : index
      %c0_7 = arith.constant 0 : index
      %7 = vector.load %arg2[%c0_6, %c0_7] : memref<128x256xf32, #tpu.memory_space<vmem>>, vector<128x256xf32>
      %c0_8 = arith.constant 0 : index
      %c0_9 = arith.constant 0 : index
      %8 = vector.load %arg3[%c0_8, %c0_9] : memref<256x128xf32, #tpu.memory_space<vmem>>, vector<256x128xf32>
      %cst_10 = arith.constant dense<0.000000e+00> : vector<128x128xf32>
      %9 = tpu.matmul %7, %8, %cst_10 {dimension_numbers = #tpu.dot_dimension_numbers<[1], [0], [0], [1], [0, 0, 1, 1], [], []>} : vector<128x256xf32>, vector<256x128xf32>, vector<128x128xf32> -> vector<128x128xf32>
      %c0_11 = arith.constant 0 : index
      %c0_12 = arith.constant 0 : index
      %10 = vector.load %arg6[%c0_11, %c0_12] : memref<128x128xf32, #tpu.memory_space<vmem>>, vector<128x128xf32>
      tpu.vector_store %arg6[%c0_11, %c0_12], %9 {strides = array<i32>} : memref<128x128xf32, #tpu.memory_space<vmem>>, vector<128x128xf32>,
    } else {
    }
    %c0 = arith.constant 0 : index
    %c0_1 = arith.constant 0 : index
    %3 = vector.load %arg4[%c0, %c0_1] : memref<128x128xf32, #tpu.memory_space<vmem>>, vector<128x128xf32>
    %c0_2 = arith.constant 0 : index
    %c0_3 = arith.constant 0 : index
    %4 = vector.load %arg6[%c0_2, %c0_3] : memref<128x128xf32, #tpu.memory_space<vmem>>, vector<128x128xf32>
    %cst = arith.constant dense<0.000000e+00> : vector<128x128xf32>
    %5 = tpu.matmul %3, %4, %cst {dimension_numbers = #tpu.dot_dimension_numbers<[1], [0], [0], [1], [0, 0, 1, 1], [], []>} : vector<128x128xf32>, vector<128x128xf32>, vector<128x128xf32> -> vector<128x128xf32>
    %c0_4 = arith.constant 0 : index
    %c0_5 = arith.constant 0 : index
    %6 = vector.load %arg5[%c0_4, %c0_5] : memref<128x128xf32, #tpu.memory_space<vmem>>, vector<128x128xf32>
    tpu.vector_store %arg5[%c0_4, %c0_5], %5 {strides = array<i32>} : memref<128x128xf32, #tpu.memory_space<vmem>>, vector<128x128xf32>,
    return
  }
  func.func @transform_0(%arg0: i32, %arg1: i32) -> (i32, i32) {
    %c0_i32 = arith.constant 0 : i32
    %c0_i32_0 = arith.constant 0 : i32
    %c0_i32_1 = arith.constant 0 : i32
    return %c0_i32, %c0_i32_0 : i32, i32
  }
  func.func @transform_1(%arg0: i32, %arg1: i32) -> (i32, i32) {
    %c0_i32 = arith.constant 0 : i32
    %c0_i32_0 = arith.constant 0 : i32
    return %c0_i32, %arg0 : i32, i32
  }
  func.func @transform_2(%arg0: i32, %arg1: i32) -> (i32, i32) {
    %c0_i32 = arith.constant 0 : i32
    %c0_i32_0 = arith.constant 0 : i32
    return %arg1, %c0_i32 : i32, i32
  }
  func.func @transform_3(%arg0: i32, %arg1: i32) -> (i32, i32) {
    %c0_i32 = arith.constant 0 : i32
    return %arg1, %arg0 : i32, i32
  }
}

</mosaic_0001>

<bundles_post_ra>
// kernel: tpu_custom_call.1
= control target key start
LH: loop header
LB: loop body
LE: loop exit
PB: predicated region body
PF: predicated region fallthrough
CT: control target
= control target key end

     0   :  { %s1336_s0 = inlined_call_operand.hbm [shape: f32[128,256], index: 0, kind: input, shape index: {}]   ;;  %s1337_s1 = inlined_call_operand.hbm [shape: f32[256,256], index: 1, kind: input, shape index: {}]   ;;  %s1338_s2 = inlined_call_operand.hbm [shape: f32[128,128], index: 2, kind: input, shape index: {}]   ;;  %s1339_s3 = inlined_call_operand.hbm [shape: f32[128,256], index: 3, kind: output, shape index: {}]  }
   0x1   :  { %1344 = sst [smem:[#allocation15_spill]] %s1336_s0 }
   0x2   :  { %1345 = sst [smem:[#allocation16_spill]] %s1338_s2 }
   0x3   :  { %8 = vsyncpa [#allocation4], 0 }
   0x4   :  { %9 = vsyncpa [#allocation7], 0 }
   0x5   :  { %11 = vsyncpa [#allocation7 + $0x1], 0 }
   0x6   :  { %12 = vsyncpa [#allocation5], 0 }
   0x7   :  { %14 = vsyncpa [#allocation5 + $0x1], 0  ;;  %s1064_s12 = smov 0   ;;  %s1066_s13 = smov 0  }
   0x8   :  { %s1068_s14 = smov 0   ;;  %s1070_s15 = smov 0  }
   0x9   :  { %s1072_s16 = smov 0   ;;  %s1074_s17 = smov 0  }
   0xa LB: > { %1346 = sst [smem:[#allocation14_spill]] %s1033_s17  ;;  %s1095_s18 = sadd.s32 4294967295, %s1033_s17   ;;  %s1033_s17 = sphi %s1074_s17, %s20_s17   ;;  %s1029_s16 = sphi %s1072_s16, %s1363_s16   ;;  %s1025_s15 = sphi %s1070_s15, %s1362_s15   ;;  %s1021_s14 = sphi %s1068_s14, %s1361_s14   ;;  %s1017_s13 = sphi %s1066_s13, %s1360_s13   ;;  %s1013_s12 = sphi %s1064_s12, %s1359_s12  }
   0xb   : > { %s699_s19 = sadd.s32 4294967294, %s1033_s17   ;;  %p67_p0 = scmp.ne.s32.totalorder %s1021_s14, %s1017_s13 }
   0xc   : > { %p68_p1 = scmp.eq.s32.totalorder %s1033_s17, 0  ;;  %p73_p2 = scmp.ne.s32.totalorder %s1017_s13, %s1013_s12 }
   0xd   : > { %p74_p3 = scmp.eq.s32.totalorder %s1095_s18, 0  ;;  %p125_p5 = scmp.eq.s32.totalorder %s1095_s18, 1 }
   0xe   : > { %p1104_p4 = por %p68_p1, %p67_p0  ;;  %p131_p7 = scmp.eq.s32.totalorder %s699_s19, 1 }
   0xf   : > { %p1111_p6 = por %p74_p3, %p73_p2  ;;  %p1115_p8 = por %p125_p5, %p67_p0 }
  0x10   : > { %p700_p9 = scmp.ge.s32.totalorder %s1033_s17, 1  ;;  %p1120_p10 = por %p131_p7, %p73_p2 }
  0x11   : > { %p138_p11 = scmp.lt.s32.totalorder %s1033_s17, 3  ;;  %s1351_s2 = sld [smem:[#allocation16_spill]] }
  0x12   : > { %s1035_s28 = smov [#allocation8]   ;;  %p703_p1 = scmp.ge.s32.totalorder %s1033_s17, 2 }
  0x13   : > { %p1128_p12 = pnand %p700_p9, %p138_p11  ;;  %s168_s29 = sshll.u32 %s1035_s28, 4  ;;  %s169_s29 = int_to_ptr.vmem [resolvable:$true] %s168_s29 }
  0x14   : > { %p792_p2 = scmp.lt.s32.totalorder %s1033_s17, 2  ;;  %s1340_s4 = smov 128  }
  0x15   : > { %p775_p13 = pneg %p1128_p12  ;;  %s1341_s5 = smov 8  }
  0x16   : > { %p1149_p5 = pnand %p792_p2, %p1104_p4  ;;  %s1355_s0 = sld [smem:[#allocation15_spill]] }
  0x17   : > { %s166_s26 = sshll.u32 %s1351_s2, 4  ;;  %p1136_p0 = pnand %p775_p13, %p74_p3  ;;  %s167_s26 = int_to_ptr.hbm [resolvable:$true] %s166_s26 }
  0x18   : > { %s1038_s10 = smov [#allocation3]   ;;  %s1039_s19 = smov 256  }
  0x19   : > { %781 = dma.hbm_to_vmem [thread:$0]  (!%p1136_p0), %s167_s26, 2048, %s169_s29, [#allocation7], %s1340_s4, %s1340_s4, %s1341_s5  }
  0x1a   : > { %s151_s11 = sshll.u32 %s1038_s10, 4  ;;  %s1040_s24 = smov 16   ;;  %s152_s11 = int_to_ptr.vmem [resolvable:$true] %s151_s11 }
  0x1b   : > { %s60_s25 = sadd.s32 1, %s1021_s14  ;;  %s32_s20 = sadd.s32 1, %s1029_s16 }
  0x1c   : > { %s149_s9 = sshll.u32 %s1355_s0, 4  ;;  %s182_s26 = sand.u32 1, %s1033_s17   ;;  %s150_s9 = int_to_ptr.hbm [resolvable:$true] %s149_s9 }
  0x1d   : > { %778 = dma.hbm_to_vmem [thread:$0]  (!%p1136_p0), %s150_s9, 4096, %s152_s11, [#allocation4], %s1039_s19, %s1039_s19, %s1040_s24  }
  0x1e   : > { %p34_p4 = scmp.ge.s32.totalorder %s32_s20, 2  ;;  %s184_s28 = sand.u32 1, %s1021_s14  }
  0x1f   : > { %s705_s29 = sshll.u32 %s1029_s16, 3  ;;  %s704_s7 = sshll.u32 %s184_s28, 8 }
  0x20   : > { %s1365_s20 = smov (%p34_p4, %s32_s20), 0  ;;  %s190_s10 = scalar_lea.hbm %s1337_s1, %s705_s29 }
  0x21   : > { %s57_s5 = ssub.s32 %s1029_s16, %s1365_s20  ;;  %s191_s30 = sshll.u32 %s190_s10, 4  ;;  %s192_s30 = int_to_ptr.hbm [resolvable:$true] %s191_s30 }
  0x22   : > { %p58_p7 = scmp.eq.s32.totalorder %s57_s5, 0  ;;  %s186_s9 = scalar_lea.vmem [#allocation6], %s704_s7 }
  0x23   : > { %s193_s11 = sshll.u32 %s186_s9, 4  ;;  %s183_s0 = scalar_lea.sflag [#allocation7], %s182_s26  ;;  %s194_s11 = int_to_ptr.vmem [resolvable:$true] %s193_s11 }
  0x24   : > { %s1171_s24 = scalar_select %p58_p7, %s1021_s14, %s60_s25  }
  0x25   : > { %s1356_s2 = smov 8   ;;  %s1357_s17 = smov 128  }
  0x26   : > { %785 = dma.hbm_to_vmem [thread:$0]  (!%p1149_p5), %s192_s30, 4096, %s194_s11, %s183_s0, %s1039_s19, %s1357_s17, %s1356_s2  }
  0x27   : > { %205 = sbr.rel (%p1128_p12) target bundleno = 548 (0x224), region = 32 }
  0x2c   : > { %996 = dma.done.wait (%p74_p3), [#allocation4], 4096  }
  0x2d   : > { %998 = vsyncadd (%p74_p3), [#allocation4], 4294963200  ;;  %s212_s4 = sand.u32 1, %s1095_s18   ;;  %s1185_s5 = sand.u32 1, %s1017_s13  }
  0x2e   : > { %s708_s6 = sshll.u32 %s1185_s5, 8  ;;  %s213_s25 = scalar_lea.sflag [#allocation7], %s212_s4 }
  0x2f   : > { %s1188_s26 = scalar_lea.vmem [#allocation6], %s708_s6 }
  0x30   : > { %1000 = dma.done.wait (%p1111_p6), %s213_s25, 4096  }
  0x31   : > { %1002 = vsyncadd (%p1111_p6), %s213_s25, 4294963200 }
  0x32   : > { %1004 = dma.done.wait (%p74_p3), [#allocation7], 2048  }
  0x33   : > { %1006 = vsyncadd (%p74_p3), [#allocation7], 4294965248  ;;  %v298_v0 = vld [vmem:[%s1188_s26 + $0x78] sm:$0xff]  ;;  %v297_v2 = vld [vmem:[%s1188_s26 + $0x70] sm:$0xff]  ;;  %s710_s0 = sshll.u32 %s1185_s5, 7  ;;  %s712_s17 = sshll.u32 %s1025_s15, 3 }
  0x34   : > { %v1200_v1 = vld [vmem:[%s1188_s26 + $0xf8] sm:$0xff]  ;;  %315 = vmatpush.msra.mxu0 %v298_v0  ;;  %715 = vmatpush.msra.mxu3 %v298_v0  ;;  %v1204_v3 = vld [vmem:[%s1188_s26 + $0xf0] sm:$0xff]  ;;  %v296_v4 = vld [vmem:[%s1188_s26 + $0x68] sm:$0xff]  ;;  %s1279_s2 = scalar_lea.vmem [#allocation9], %s710_s0  ;;  %s588_s27 = scalar_lea.hbm %s1339_s3, %s712_s17 }
  0x35   : > { %380 = vmatpush.msra.mxu1 %v1200_v1  ;;  %v1209_v5 = vld [vmem:[%s1188_s26 + $0xe8] sm:$0xff]  ;;  %v295_v6 = vld [vmem:[%s1188_s26 + $0x60] sm:$0xff]  ;;  %v294_v8 = vld [vmem:[%s1188_s26 + $0x58] sm:$0xff]  ;;  %s589_s19 = sshll.u32 %s1279_s2, 4  ;;  %s591_s28 = sshll.u32 %s588_s27, 4  ;;  %s590_s19 = int_to_ptr.vmem [resolvable:$true] %s589_s19  ;;  %s592_s28 = int_to_ptr.hbm [resolvable:$true] %s591_s28 }
  0x36   : > { %316 = vmatpush.msra.mxu0 %v297_v2  ;;  %716 = vmatpush.msra.mxu3 %v297_v2  ;;  %v1214_v7 = vld [vmem:[%s1188_s26 + $0xe0] sm:$0xff]  ;;  %v1219_v9 = vld [vmem:[%s1188_s26 + $0xd8] sm:$0xff]  ;;  %v293_v10 = vld [vmem:[%s1188_s26 + $0x50] sm:$0xff]  ;;  %s575_s29 = scalar_lea.sflag [#allocation5], %s1185_s5  ;;  %s957_s7 = sshra.s32 %s592_s28, 4  ;;  %s958_s7 = int_to_ptr.hbm [resolvable:$true] %s957_s7 }
  0x37   : > { %381 = vmatpush.msra.mxu1 %v1204_v3  ;;  %v1224_v11 = vld [vmem:[%s1188_s26 + $0xd0] sm:$0xff]  ;;  %v292_v12 = vld [vmem:[%s1188_s26 + $0x48] sm:$0xff]  ;;  %v291_v14 = vld [vmem:[%s1188_s26 + $0x40] sm:$0xff]  ;;  %s959_s8 = scalar_lea.hbm %s958_s7, 128  ;;  %s963_s30 = scalar_lea.hbm %s1339_s3, 256 }
  0x38   : > { %317 = vmatpush.msra.mxu0 %v296_v4  ;;  %717 = vmatpush.msra.mxu3 %v296_v4  ;;  %v1229_v13 = vld [vmem:[%s1188_s26 + $0xc8] sm:$0xff]  ;;  %v1234_v15 = vld [vmem:[%s1188_s26 + $0xc0] sm:$0xff]  ;;  %v290_v16 = vld [vmem:[%s1188_s26 + $0x38] sm:$0xff]  ;;  %p960_p3 = scmp.ne.s32.totalorder %s958_s7, %s959_s8  ;;  %p964_p11 = scmp.lt.s32.totalorder %s958_s7, %s1339_s3 }
  0x39   : > { %382 = vmatpush.msra.mxu1 %v1209_v5  ;;  %v1239_v17 = vld [vmem:[%s1188_s26 + $0xb8] sm:$0xff]  ;;  %v289_v18 = vld [vmem:[%s1188_s26 + $0x30] sm:$0xff]  ;;  %v288_v20 = vld [vmem:[%s1188_s26 + $0x28] sm:$0xff]  ;;  %p965_p12 = scmp.lt.s32.totalorder %s963_s30, %s959_s8 }
  0x3a   : > { %318 = vmatpush.msra.mxu0 %v295_v6  ;;  %718 = vmatpush.msra.mxu3 %v295_v6  ;;  %v305_v19 = vld [vmem:[%s1188_s26 + $0xb0] sm:$0xff]  ;;  %v304_v21 = vld [vmem:[%s1188_s26 + $0xa8] sm:$0xff]  ;;  %v287_v22 = vld [vmem:[%s1188_s26 + $0x20] sm:$0xff]  ;;  %p961_p6 = pnand %p960_p3, %p1115_p8 }
  0x3b   : > { %383 = vmatpush.msra.mxu1 %v1214_v7  ;;  %v303_v23 = vld [vmem:[%s1188_s26 + $0xa0] sm:$0xff]  ;;  %v286_v24 = vld [vmem:[%s1188_s26 + $0x18] sm:$0xff]  ;;  %v285_v26 = vld [vmem:[%s1188_s26 + $0x10] sm:$0xff]  ;;  %p966_p13 = por %p965_p12, %p964_p11 }
  0x3c   : > { %319 = vmatpush.msra.mxu0 %v294_v8  ;;  %719 = vmatpush.msra.mxu3 %v294_v8  ;;  %v302_v25 = vld [vmem:[%s1188_s26 + $0x98] sm:$0xff]  ;;  %v301_v27 = vld [vmem:[%s1188_s26 + $0x90] sm:$0xff]  ;;  %v284_v28 = vld [vmem:[%s1188_s26 + $0x8] sm:$0xff]  ;;  %p962_p9 = pneg %p961_p6 }
  0x3d   : > { %384 = vmatpush.msra.mxu1 %v1219_v9  ;;  %v300_v29 = vld [vmem:[%s1188_s26 + $0x88] sm:$0xff]  ;;  %v283_v30 = vld [vmem:[%s1188_s26] sm:$0xff]  ;;  %v253_v35 = vld [vmem:[#allocation3 + $0x10] sm:$0xff] }
  0x3e   : > { %320 = vmatpush.msra.mxu0 %v293_v10  ;;  %720 = vmatpush.msra.mxu3 %v293_v10  ;;  %v299_v31 = vld [vmem:[%s1188_s26 + $0x80] sm:$0xff]  ;;  %v252_v34 = vld [vmem:[#allocation3 + $0x8] sm:$0xff]  ;;  %v277_v36 = vld [vmem:[#allocation3 + $0xd0] sm:$0xff]  ;;  %p967_p0 = pnand %p966_p13, %p962_p9 }
  0x3f   : > { %385 = vmatpush.msra.mxu1 %v1224_v11  ;;  %v251_v32 = vld [vmem:[#allocation3] sm:$0xff]  ;;  %v254_v37 = vld [vmem:[#allocation3 + $0x18] sm:$0xff]  ;;  %v256_v40 = vld [vmem:[#allocation3 + $0x28] sm:$0xff] }
  0x40   : > { %321 = vmatpush.msra.mxu0 %v292_v12  ;;  %721 = vmatpush.msra.mxu3 %v292_v12  ;;  %v275_v33 = vld [vmem:[#allocation3 + $0xc0] sm:$0xff]  ;;  %v257_v41 = vld [vmem:[#allocation3 + $0x30] sm:$0xff]  ;;  %v258_v43 = vld [vmem:[#allocation3 + $0x38] sm:$0xff] }
  0x41   : > { %386 = vmatpush.msra.mxu1 %v1229_v13  ;;  %v255_v38 = vld [vmem:[#allocation3 + $0x20] sm:$0xff]  ;;  %v281_v42 = vld [vmem:[#allocation3 + $0xf0] sm:$0xff]  ;;  %v260_v45 = vld [vmem:[#allocation3 + $0x48] sm:$0xff] }
  0x42   : > { %322 = vmatpush.msra.mxu0 %v291_v14  ;;  %722 = vmatpush.msra.mxu3 %v291_v14  ;;  %v279_v39 = vld [vmem:[#allocation3 + $0xe0] sm:$0xff]  ;;  %v276_v46 = vld [vmem:[#allocation3 + $0xc8] sm:$0xff]  ;;  %v261_v47 = vld [vmem:[#allocation3 + $0x50] sm:$0xff] }
  0x43   : > { %387 = vmatpush.msra.mxu1 %v1234_v15  ;;  %v259_v44 = vld [vmem:[#allocation3 + $0x40] sm:$0xff]  ;;  %v262_v48 = vld [vmem:[#allocation3 + $0x58] sm:$0xff]  ;;  %v264_v51 = vld [vmem:[#allocation3 + $0x68] sm:$0xff] }
  0x44   : > { %323 = vmatpush.msra.mxu0 %v290_v16  ;;  %723 = vmatpush.msra.mxu3 %v290_v16  ;;  %v278_v49 = vld [vmem:[#allocation3 + $0xd8] sm:$0xff]  ;;  %v263_v50 = vld [vmem:[#allocation3 + $0x60] sm:$0xff]  ;;  %v280_v52 = vld [vmem:[#allocation3 + $0xe8] sm:$0xff] }
  0x45   : > { %388 = vmatpush.msra.mxu1 %v1239_v17  ;;  %v265_v53 = vld [vmem:[#allocation3 + $0x70] sm:$0xff]  ;;  %v266_v54 = vld [vmem:[#allocation3 + $0x78] sm:$0xff]  ;;  %v267_v56 = vld [vmem:[#allocation3 + $0x80] sm:$0xff] }
  0x46   : > { %324 = vmatpush.msra.mxu0 %v289_v18  ;;  %724 = vmatpush.msra.mxu3 %v289_v18  ;;  %v282_v55 = vld [vmem:[#allocation3 + $0xf8] sm:$0xff]  ;;  %v268_v57 = vld [vmem:[#allocation3 + $0x88] sm:$0xff]  ;;  %v269_v58 = vld [vmem:[#allocation3 + $0x90] sm:$0xff] }
  0x47   : > { %389 = vmatpush.msra.mxu1 %v305_v19  ;;  %v270_v59 = vld [vmem:[#allocation3 + $0x98] sm:$0xff]  ;;  %v271_v60 = vld [vmem:[#allocation3 + $0xa0] sm:$0xff]  ;;  %v272_v61 = vld [vmem:[#allocation3 + $0xa8] sm:$0xff] }
  0x48   : > { %325 = vmatpush.msra.mxu0 %v288_v20  ;;  %725 = vmatpush.msra.mxu3 %v288_v20  ;;  %v273_v62 = vld [vmem:[#allocation3 + $0xb0] sm:$0xff]  ;;  %v274_v63 = vld [vmem:[#allocation3 + $0xb8] sm:$0xff] }
  0x49   : > { %390 = vmatpush.msra.mxu1 %v304_v21 }
  0x4a   : > { %326 = vmatpush.msra.mxu0 %v287_v22  ;;  %726 = vmatpush.msra.mxu3 %v287_v22 }
  0x4b   : > { %391 = vmatpush.msra.mxu1 %v303_v23 }
  0x4c   : > { %327 = vmatpush.msra.mxu0 %v286_v24  ;;  %727 = vmatpush.msra.mxu3 %v286_v24 }
  0x4d   : > { %392 = vmatpush.msra.mxu1 %v302_v25 }
  0x4e   : > { %328 = vmatpush.msra.mxu0 %v285_v26  ;;  %728 = vmatpush.msra.mxu3 %v285_v26 }
  0x4f   : > { %393 = vmatpush.msra.mxu1 %v301_v27 }
  0x50   : > { %329 = vmatpush.msra.mxu0 %v284_v28  ;;  %729 = vmatpush.msra.mxu3 %v284_v28 }
  0x51   : > { %394 = vmatpush.msra.mxu1 %v300_v29 }
  0x52   : > { %330 = vmatpush.msra.mxu0 %v283_v30  ;;  %730 = vmatpush.msra.mxu3 %v283_v30 }
  0x53   : > { %395 = vmatpush.msra.mxu1 %v299_v31  ;;  %331 = vmatmul.f32.vlgmr.msra.gmra.mxu0 %v251_v32 }
  0x54   : > { %367 = vmatmul.f32.vlgmr.msra.gmra.mxu3 %v275_v33  ;;  %396 = vmatmul.f32.vlgmr.msra.gmra.mxu1 %v252_v34 }
  0x55   : > { %731 = vmatpush.msrb.mxu3 %v1200_v1 }
  0x57   : > { %732 = vmatpush.msrb.mxu3 %v1204_v3 }
  0x59   : > { %733 = vmatpush.msrb.mxu3 %v1209_v5 }
  0x5b   : > { %734 = vmatpush.msrb.mxu3 %v1214_v7  ;;  %334 = vmatmul.f32.gmra.mxu0 %v253_v35 }
  0x5c   : > { %370 = vmatmul.f32.gmra.mxu3 %v277_v36  ;;  %399 = vmatmul.f32.gmra.mxu1 %v254_v37 }
  0x5d   : > { %735 = vmatpush.msrb.mxu3 %v1219_v9 }
  0x5f   : > { %736 = vmatpush.msrb.mxu3 %v1224_v11 }
  0x61   : > { %737 = vmatpush.msrb.mxu3 %v1229_v13 }
  0x63   : > { %738 = vmatpush.msrb.mxu3 %v1234_v15  ;;  %337 = vmatmul.f32.gmra.mxu0 %v255_v38 }
  0x64   : > { %373 = vmatmul.f32.gmra.mxu3 %v279_v39  ;;  %402 = vmatmul.f32.gmra.mxu1 %v256_v40 }
  0x65   : > { %739 = vmatpush.msrb.mxu3 %v1239_v17 }
  0x67   : > { %740 = vmatpush.msrb.mxu3 %v305_v19 }
  0x69   : > { %741 = vmatpush.msrb.mxu3 %v304_v21 }
  0x6b   : > { %742 = vmatpush.msrb.mxu3 %v303_v23  ;;  %340 = vmatmul.f32.gmra.mxu0 %v257_v41 }
  0x6c   : > { %376 = vmatmul.f32.gmra.mxu3 %v281_v42  ;;  %405 = vmatmul.f32.gmra.mxu1 %v258_v43 }
  0x6d   : > { %743 = vmatpush.msrb.mxu3 %v302_v25 }
  0x6f   : > { %744 = vmatpush.msrb.mxu3 %v301_v27 }
  0x71   : > { %745 = vmatpush.msrb.mxu3 %v300_v29 }
  0x73   : > { %746 = vmatpush.msrb.mxu3 %v299_v31  ;;  %343 = vmatmul.f32.gmra.mxu0 %v259_v44 }
  0x74   : > { %408 = vmatmul.f32.gmra.mxu1 %v260_v45  ;;  %432 = vmatmul.f32.vlgmr.msrb.gmra.mxu3 %v276_v46 }
  0x7b   : > { %346 = vmatmul.f32.gmra.mxu0 %v261_v47 }
  0x7c   : > { %411 = vmatmul.f32.gmra.mxu1 %v262_v48  ;;  %435 = vmatmul.f32.gmra.mxu3 %v278_v49  ;;  %v461_v48 = vld [vmem:[#allocation8] sm:$0xff]  ;;  %v462_v49 = vld [vmem:[#allocation8 + $0x8] sm:$0xff] }
  0x83   : > { %349 = vmatmul.f32.gmra.mxu0 %v263_v50  ;;  %v463_v50 = vld [vmem:[#allocation8 + $0x10] sm:$0xff] }
  0x84   : > { %414 = vmatmul.f32.gmra.mxu1 %v264_v51  ;;  %438 = vmatmul.f32.gmra.mxu3 %v280_v52  ;;  %v464_v51 = vld [vmem:[#allocation8 + $0x18] sm:$0xff]  ;;  %v465_v52 = vld [vmem:[#allocation8 + $0x20] sm:$0xff] }
  0x8b   : > { %352 = vmatmul.f32.gmra.mxu0 %v265_v53  ;;  %v473_v53 = vld [vmem:[#allocation8 + $0x60] sm:$0xff] }
  0x8c   : > { %417 = vmatmul.f32.gmra.mxu1 %v266_v54  ;;  %441 = vmatmul.f32.gmra.mxu3 %v282_v55  ;;  %v466_v54 = vld [vmem:[#allocation8 + $0x28] sm:$0xff] }
  0x8d   : > { %v474_v55 = vld [vmem:[#allocation8 + $0x68] sm:$0xff] }
  0x93   : > { %355 = vmatmul.f32.gmra.mxu0 %v267_v56  ;;  %v467_v56 = vld [vmem:[#allocation8 + $0x30] sm:$0xff] }
  0x94   : > { %420 = vmatmul.f32.gmra.mxu1 %v268_v57  ;;  %v475_v57 = vld [vmem:[#allocation8 + $0x70] sm:$0xff] }
  0x9b   : > { %358 = vmatmul.f32.gmra.mxu0 %v269_v58  ;;  %v468_v58 = vld [vmem:[#allocation8 + $0x38] sm:$0xff] }
  0x9c   : > { %423 = vmatmul.f32.gmra.mxu1 %v270_v59  ;;  %v476_v59 = vld [vmem:[#allocation8 + $0x78] sm:$0xff] }
  0xa3   : > { %361 = vmatmul.f32.gmra.mxu0 %v271_v60  ;;  %v469_v60 = vld [vmem:[#allocation8 + $0x40] sm:$0xff] }
  0xa4   : > { %426 = vmatmul.f32.gmra.mxu1 %v272_v61  ;;  %v470_v61 = vld [vmem:[#allocation8 + $0x48] sm:$0xff] }
  0xab   : > { %364 = vmatmul.f32.gmra.mxu0 %v273_v62  ;;  %v471_v62 = vld [vmem:[#allocation8 + $0x50] sm:$0xff] }
  0xac   : > { %429 = vmatmul.f32.gmra.mxu1 %v274_v63  ;;  %v472_v63 = vld [vmem:[#allocation8 + $0x58] sm:$0xff] }
  0xd0   : > { %v332_v0 = vpop.f32.mrf.mxu0 }
  0xd1   : > { %v397_v1 = vpop.f32.mrf.mxu1 }
  0xd2   : > { %v1266_v2 = vadd.f32 %v397_v1, %v332_v0 }
  0xd7   : > { %v368_v3 = vpop.f32.mrf.mxu3 }
  0xd8   : > { %v335_v4 = vpop.f32.mrf.mxu0 }
  0xd9   : > { %v400_v5 = vpop.f32.mrf.mxu1 }
  0xda   : > { %v1268_v6 = vadd.f32 %v400_v5, %v335_v4 }
  0xdf   : > { %v371_v7 = vpop.f32.mrf.mxu3 }
  0xe0   : > { %v338_v8 = vpop.f32.mrf.mxu0 }
  0xe1   : > { %v403_v9 = vpop.f32.mrf.mxu1 }
  0xe2   : > { %v1270_v10 = vadd.f32 %v403_v9, %v338_v8 }
  0xe7   : > { %v374_v11 = vpop.f32.mrf.mxu3 }
  0xe8   : > { %v341_v12 = vpop.f32.mrf.mxu0 }
  0xe9   : > { %v406_v13 = vpop.f32.mrf.mxu1 }
  0xea   : > { %v407_v14 = vadd.f32 %v406_v13, %v341_v12 }
  0xef   : > { %v377_v15 = vpop.f32.mrf.mxu3 }
  0xf0   : > { %v344_v16 = vpop.f32.mrf.mxu0 }
  0xf1   : > { %v409_v17 = vpop.f32.mrf.mxu1 }
  0xf2   : > { %v410_v18 = vadd.f32 %v409_v17, %v344_v16 }
  0xf7   : > { %v433_v19 = vpop.f32.mrf.mxu3 }
  0xf8   : > { %v347_v20 = vpop.f32.mrf.mxu0  ;;  %v434_v34 = vadd.f32 %v433_v19, %v368_v3 }
  0xf9   : > { %v412_v21 = vpop.f32.mrf.mxu1 }
  0xfa   : > { %v413_v47 = vadd.f32 %v412_v21, %v347_v20 }
  0xff   : > { %v436_v22 = vpop.f32.mrf.mxu3 }
 0x100   : > { %v350_v23 = vpop.f32.mrf.mxu0  ;;  %v437_v33 = vadd.f32 %v436_v22, %v371_v7 }
 0x101   : > { %v415_v24 = vpop.f32.mrf.mxu1 }
 0x102   : > { %v416_v46 = vadd.f32 %v415_v24, %v350_v23 }
 0x107   : > { %v439_v25 = vpop.f32.mrf.mxu3 }
 0x108   : > { %v353_v26 = vpop.f32.mrf.mxu0  ;;  %v440_v32 = vadd.f32 %v439_v25, %v374_v11 }
 0x109   : > { %v418_v27 = vpop.f32.mrf.mxu1 }
 0x10a   : > { %v419_v45 = vadd.f32 %v418_v27, %v353_v26 }
 0x10f   : > { %v442_v28 = vpop.f32.mrf.mxu3 }
 0x110   : > { %v443_v29 = vadd.f32 %v442_v28, %v377_v15  ;;  %v356_v30 = vpop.f32.mrf.mxu0 }
 0x111   : > { %v421_v31 = vpop.f32.mrf.mxu1 }
 0x112   : > { %493 = vmatpush.msra.mxu2 %v443_v29  ;;  %747 = vmatpush.msra.mxu3 %v443_v29  ;;  %v422_v44 = vadd.f32 %v421_v31, %v356_v30 }
 0x114   : > { %494 = vmatpush.msra.mxu2 %v440_v32  ;;  %748 = vmatpush.msra.mxu3 %v440_v32 }
 0x116   : > { %495 = vmatpush.msra.mxu2 %v437_v33  ;;  %749 = vmatpush.msra.mxu3 %v437_v33 }
 0x118   : > { %496 = vmatpush.msra.mxu2 %v434_v34  ;;  %750 = vmatpush.msra.mxu3 %v434_v34  ;;  %v359_v35 = vpop.f32.mrf.mxu0 }
 0x119   : > { %v424_v36 = vpop.f32.mrf.mxu1 }
 0x11a   : > { %v425_v43 = vadd.f32 %v424_v36, %v359_v35 }
 0x120   : > { %v362_v37 = vpop.f32.mrf.mxu0 }
 0x121   : > { %v427_v38 = vpop.f32.mrf.mxu1 }
 0x122   : > { %v428_v42 = vadd.f32 %v427_v38, %v362_v37 }
 0x128   : > { %v365_v39 = vpop.f32.mrf.mxu0 }
 0x129   : > { %v430_v40 = vpop.f32.mrf.mxu1 }
 0x12a   : > { %v431_v41 = vadd.f32 %v430_v40, %v365_v39 }
 0x12c   : > { %497 = vmatpush.msra.mxu2 %v431_v41  ;;  %751 = vmatpush.msra.mxu3 %v431_v41 }
 0x12e   : > { %498 = vmatpush.msra.mxu2 %v428_v42  ;;  %752 = vmatpush.msra.mxu3 %v428_v42 }
 0x130   : > { %499 = vmatpush.msra.mxu2 %v425_v43  ;;  %753 = vmatpush.msra.mxu3 %v425_v43 }
 0x132   : > { %500 = vmatpush.msra.mxu2 %v422_v44  ;;  %754 = vmatpush.msra.mxu3 %v422_v44 }
 0x134   : > { %501 = vmatpush.msra.mxu2 %v419_v45  ;;  %755 = vmatpush.msra.mxu3 %v419_v45 }
 0x136   : > { %502 = vmatpush.msra.mxu2 %v416_v46  ;;  %756 = vmatpush.msra.mxu3 %v416_v46 }
 0x138   : > { %503 = vmatpush.msra.mxu2 %v413_v47  ;;  %757 = vmatpush.msra.mxu3 %v413_v47 }
 0x13a   : > { %504 = vmatpush.msra.mxu2 %v410_v18  ;;  %758 = vmatpush.msra.mxu3 %v410_v18 }
 0x13c   : > { %505 = vmatpush.msra.mxu2 %v407_v14  ;;  %759 = vmatpush.msra.mxu3 %v407_v14 }
 0x13e   : > { %506 = vmatpush.msra.mxu2 %v1270_v10  ;;  %760 = vmatpush.msra.mxu3 %v1270_v10 }
 0x140   : > { %507 = vmatpush.msra.mxu2 %v1268_v6  ;;  %761 = vmatpush.msra.mxu3 %v1268_v6 }
 0x142   : > { %508 = vmatpush.msra.mxu2 %v1266_v2  ;;  %762 = vmatpush.msra.mxu3 %v1266_v2 }
 0x143   : > { %509 = vmatmul.f32.vlgmr.msra.gmra.mxu2 %v461_v48  ;;  %545 = vmatmul.f32.vlgmr.msra.gmra.mxu3 %v473_v53 }
 0x14b   : > { %512 = vmatmul.f32.gmra.mxu2 %v462_v49  ;;  %548 = vmatmul.f32.gmra.mxu3 %v474_v55 }
 0x153   : > { %515 = vmatmul.f32.gmra.mxu2 %v463_v50  ;;  %551 = vmatmul.f32.gmra.mxu3 %v475_v57 }
 0x15b   : > { %518 = vmatmul.f32.gmra.mxu2 %v464_v51  ;;  %554 = vmatmul.f32.gmra.mxu3 %v476_v59 }
 0x163   : > { %521 = vmatmul.f32.gmra.mxu2 %v465_v52 }
 0x16b   : > { %524 = vmatmul.f32.gmra.mxu2 %v466_v54 }
 0x173   : > { %527 = vmatmul.f32.gmra.mxu2 %v467_v56 }
 0x17b   : > { %530 = vmatmul.f32.gmra.mxu2 %v468_v58 }
 0x183   : > { %533 = vmatmul.f32.gmra.mxu2 %v469_v60 }
 0x18b   : > { %536 = vmatmul.f32.gmra.mxu2 %v470_v61 }
 0x193   : > { %539 = vmatmul.f32.gmra.mxu2 %v471_v62 }
 0x19b   : > { %542 = vmatmul.f32.gmra.mxu2 %v472_v63 }
 0x1c6   : > { %v510_v0 = vpop.f32.mrf.mxu2  ;;  %v546_v5 = vpop.f32.mrf.mxu3 }
 0x1c7   : > { %558 = vst [vmem:[%s1279_s2] sm:$0xff] %v510_v0 }
 0x1c8   : > { %570 = vst [vmem:[%s1279_s2 + $0x60] sm:$0xff] %v546_v5 }
 0x1ce   : > { %v513_v1 = vpop.f32.mrf.mxu2  ;;  %v549_v7 = vpop.f32.mrf.mxu3 }
 0x1cf   : > { %559 = vst [vmem:[%s1279_s2 + $0x8] sm:$0xff] %v513_v1 }
 0x1d0   : > { %571 = vst [vmem:[%s1279_s2 + $0x68] sm:$0xff] %v549_v7 }
 0x1d6   : > { %v516_v2 = vpop.f32.mrf.mxu2  ;;  %v552_v9 = vpop.f32.mrf.mxu3 }
 0x1d7   : > { %560 = vst [vmem:[%s1279_s2 + $0x10] sm:$0xff] %v516_v2 }
 0x1d8   : > { %572 = vst [vmem:[%s1279_s2 + $0x70] sm:$0xff] %v552_v9 }
 0x1de   : > { %v519_v3 = vpop.f32.mrf.mxu2  ;;  %v555_v11 = vpop.f32.mrf.mxu3 }
 0x1df   : > { %561 = vst [vmem:[%s1279_s2 + $0x18] sm:$0xff] %v519_v3 }
 0x1e0   : > { %573 = vst [vmem:[%s1279_s2 + $0x78] sm:$0xff] %v555_v11 }
 0x1e6   : > { %v522_v4 = vpop.f32.mrf.mxu2 }
 0x1e7   : > { %562 = vst [vmem:[%s1279_s2 + $0x20] sm:$0xff] %v522_v4 }
 0x1ee   : > { %v525_v6 = vpop.f32.mrf.mxu2 }
 0x1ef   : > { %563 = vst [vmem:[%s1279_s2 + $0x28] sm:$0xff] %v525_v6 }
 0x1f6   : > { %v528_v8 = vpop.f32.mrf.mxu2 }
 0x1f7   : > { %564 = vst [vmem:[%s1279_s2 + $0x30] sm:$0xff] %v528_v8 }
 0x1fe   : > { %v531_v10 = vpop.f32.mrf.mxu2 }
 0x1ff   : > { %565 = vst [vmem:[%s1279_s2 + $0x38] sm:$0xff] %v531_v10 }
 0x206   : > { %v534_v12 = vpop.f32.mrf.mxu2 }
 0x207   : > { %566 = vst [vmem:[%s1279_s2 + $0x40] sm:$0xff] %v534_v12 }
 0x20e   : > { %v537_v13 = vpop.f32.mrf.mxu2 }
 0x20f   : > { %567 = vst [vmem:[%s1279_s2 + $0x48] sm:$0xff] %v537_v13 }
 0x216   : > { %v540_v14 = vpop.f32.mrf.mxu2 }
 0x217   : > { %568 = vst [vmem:[%s1279_s2 + $0x50] sm:$0xff] %v540_v14 }
 0x21e   : > { %v543_v15 = vpop.f32.mrf.mxu2 }
 0x21f   : > { %569 = vst [vmem:[%s1279_s2 + $0x58] sm:$0xff] %v543_v15 }
 0x220   : > { %970 = shalt.err (!%p967_p0)
}
 0x221   : > { %s1041_s4 = smov 128   ;;  %s1042_s5 = smov 256  }
 0x222   : > { %s1043_s6 = smov 8  }
 0x223   : > { %773 = dma.vmem_to_hbm [thread:$0]  (%p1115_p8), %s590_s19, 2048, %s592_s28, %s575_s29, %s1041_s4, %s1042_s5, %s1043_s6  }
 0x224 PF: > { %s1358_s25 = sld [smem:[#allocation14_spill]]  ;;  %s606_s26 = sand.u32 1, %s1013_s12  }
 0x225   : > { %p787_p2 = pnand %p703_p1, %p1120_p10  ;;  %s607_s0 = scalar_lea.sflag [#allocation5], %s606_s26 }
 0x227   : > { %p788_p5 = pneg %p787_p2 }
 0x229   : > { %1008 = dma.done.wait (%p788_p5), %s607_s0, 2048  }
 0x22a   : > { %1010 = vsyncadd (%p788_p5), %s607_s0, 4294965248  ;;  %s20_s17 = sadd.s32 1, %s1358_s25   ;;  %s1359_s12 = smov %s1017_s13 }
 0x22b   : > { %p17_p4 = scmp.ge.s32.totalorder %s20_s17, 4   ;;  %s1360_s13 = smov %s1021_s14 }
 0x22c   : > { %s1361_s14 = smov %s1171_s24  ;;  %s1362_s15 = smov %s1029_s16 }
 0x22d   : > { %s1363_s16 = smov %s1365_s20  ;;  %19 = sbr.rel (!%p17_p4) target bundleno = 10 (0xa), region = 91 }
 0x232   :  { %613 = vsyncpa [#allocation4], 1 }
 0x233   :  { %615 = vsyncpa [#allocation4 + $0x1], 1 }
 0x234   :  { %616 = vsyncpa [#allocation7], 1 }
 0x235   :  { %618 = vsyncpa [#allocation7 + $0x1], 1 }
 0x236   :  { %619 = vsyncpa [#allocation5], 1 }
 0x237   :  { %621 = vsyncpa [#allocation5 + $0x1], 1 }

</bundles_post_ra>
